<compile_context>
chip_gen: v7x
topology: tpu7x:2x2x1
jax: 0.10.0
libtpu: 0.0.40
codegen_flags: <defaults>
</compile_context>

<pallas_src>
import math
from functools import partial

import jax
import jax.numpy as jnp
from jax.experimental import pallas as pl
from jax.experimental.pallas import tpu as pltpu

HIDDEN = 10     # fc1 output features (fixed by the module definition)
LANE = 128      # TPU lane width


def _round_up(x, m):
    return ((x + m - 1) // m) * m


# ----------------------------------------------------------------------------
# Fused MLP kernel: out = relu(x @ W1 + b1) @ W2 + b2   (all tiles in VMEM).
# ----------------------------------------------------------------------------
def mlp_kernel(x_ref, w1_ref, b1_ref, w2_ref, b2_ref, out_ref):
    # x_ref: (Bt, D)   w1_ref: (D, Hp)  b1_ref: (1, Hp)
    # w2_ref: (Hp, Op) b2_ref: (1, Op)  out_ref: (Bt, Op)
    x = x_ref[...]
    h = jnp.maximum(
        jnp.dot(x, w1_ref[...], preferred_element_type=jnp.float32) + b1_ref[...],
        0.0,
    )
    y = jnp.dot(h, w2_ref[...], preferred_element_type=jnp.float32) + b2_ref[...]
    out_ref[...] = y.astype(out_ref.dtype)


# ----------------------------------------------------------------------------
# Wrapper: flatten leading dims, pad to TPU-friendly tiles, call the kernel.
# ----------------------------------------------------------------------------
@partial(jax.jit, static_argnames=("row_tile",))
def deep_set_decoder_forward(x, params, row_tile=1024):
    orig_shape = x.shape
    D = orig_shape[-1]                      # input_size
    O = params["fc2_w"].shape[0]            # output_size

    Hp = _round_up(HIDDEN, LANE)            # lane-dense hidden width (128)
    Op = _round_up(O, LANE)                 # lane-dense output width (128)

    # Zero-padded, transposed (in, out) weights -> lane-dense matmuls & stores.
    # These are tiny one-time ops under jit; padded lanes are mathematically inert.
    w1 = jnp.zeros((D, Hp), jnp.float32).at[:, :HIDDEN].set(params["fc1_w"].T)
    b1 = jnp.zeros((1, Hp), jnp.float32).at[:, :HIDDEN].set(params["fc1_b"])
    w2 = jnp.zeros((Hp, Op), jnp.float32).at[:HIDDEN, :O].set(params["fc2_w"].T)
    b2 = jnp.zeros((1, Op), jnp.float32).at[:, :O].set(params["fc2_b"])

    # Flatten all leading dims into one big row axis (fills the MXU M dim).
    x2 = x.reshape(-1, D).astype(jnp.float32)
    N = x2.shape[0]
    Bt = min(row_tile, _round_up(N, 8))     # sublane-aligned row tile
    Np = _round_up(N, Bt)
    if Np != N:
        x2 = jnp.pad(x2, ((0, Np - N), (0, 0)))

    out = pl.pallas_call(
        mlp_kernel,
        out_shape=jax.ShapeDtypeStruct((Np, Op), jnp.float32),
        grid=(Np // Bt,),
        in_specs=[
            pl.BlockSpec((Bt, D), lambda i: (i, 0)),
            pl.BlockSpec((D, Hp), lambda i: (0, 0)),
            pl.BlockSpec((1, Hp), lambda i: (0, 0)),
            pl.BlockSpec((Hp, Op), lambda i: (0, 0)),
            pl.BlockSpec((1, Op), lambda i: (0, 0)),
        ],
        out_specs=pl.BlockSpec((Bt, Op), lambda i: (i, 0)),
        compiler_params=pltpu.CompilerParams(
            dimension_semantics=("parallel",),
        ),
    )(x2, w1, b1, w2, b2)

    y = out[:N, :O]
    return y.reshape(orig_shape[:-1] + (O,))


# ----------------------------------------------------------------------------
# PyTorch-style parameter init (nn.Linear default: U(-1/sqrt(fan_in), +...)).
# ----------------------------------------------------------------------------
def init_params(key, input_size, output_size=1):
    k1, k2, k3, k4 = jax.random.split(key, 4)
    b1 = 1.0 / math.sqrt(input_size)
    b2 = 1.0 / math.sqrt(HIDDEN)
    return {
        "fc1_w": jax.random.uniform(k1, (HIDDEN, input_size), jnp.float32, -b1, b1),
        "fc1_b": jax.random.uniform(k2, (HIDDEN,), jnp.float32, -b1, b1),
        "fc2_w": jax.random.uniform(k3, (output_size, HIDDEN), jnp.float32, -b2, b2),
        "fc2_b": jax.random.uniform(k4, (output_size,), jnp.float32, -b2, b2),
    }


# ----------------------------------------------------------------------------
# Pure-JAX reference (mirrors the PyTorch forward exactly).
# ----------------------------------------------------------------------------
def reference_forward(x, params):
    h = jnp.maximum(x @ params["fc1_w"].T + params["fc1_b"], 0.0)
    return h @ params["fc2_w"].T + params["fc2_b"]


# ----------------------------------------------------------------------------
if __name__ == "__main__":
    B, S, input_size, output_size = 4, 16, 32, 1   # (batch, set elements, features)

    key = jax.random.PRNGKey(0)
    k_param, k_x = jax.random.split(key)
    params = init_params(k_param, input_size, output_size)
    x = jax.random.normal(k_x, (B, S, input_size), jnp.float32)

    y = deep_set_decoder_forward(x, params)
    y = jax.block_until_ready(y)

    y_ref = reference_forward(x, params)
    assert y.shape == (B, S, output_size), y.shape
    max_err = float(jnp.max(jnp.abs(y - y_ref)))
    assert max_err < 1e-4, f"mismatch vs reference: {max_err}"

    print("KERNEL_OK")
</pallas_src>

<mosaic_0001>
module attributes {stable_mosaic.version = 11 : i64} {
  func.func @mlp_kernel(%arg0: i32, %arg1: memref<64x32xf32, #tpu.memory_space<vmem>>, %arg2: memref<32x128xf32, #tpu.memory_space<vmem>>, %arg3: memref<1x128xf32, #tpu.memory_space<vmem>>, %arg4: memref<128x128xf32, #tpu.memory_space<vmem>>, %arg5: memref<1x128xf32, #tpu.memory_space<vmem>>, %arg6: memref<64x128xf32, #tpu.memory_space<vmem>>) attributes {dimension_semantics = [#tpu.dimension_semantics<parallel>], iteration_bounds = array<i64: 1>, scalar_prefetch = 0 : i64, scratch_operands = 0 : i64, tpu.core_type = #tpu.core_type<tc>, window_params = [{transform_indices = @transform_0, window_bounds = array<i64: 64, 32>}, {pipeline_mode = #tpu.pipeline_mode<synchronous>, transform_indices = @transform_1, window_bounds = array<i64: 32, 128>}, {pipeline_mode = #tpu.pipeline_mode<synchronous>, transform_indices = @transform_2, window_bounds = array<i64: 1, 128>}, {pipeline_mode = #tpu.pipeline_mode<synchronous>, transform_indices = @transform_3, window_bounds = array<i64: 128, 128>}, {pipeline_mode = #tpu.pipeline_mode<synchronous>, transform_indices = @transform_4, window_bounds = array<i64: 1, 128>}, {transform_indices = @transform_5, window_bounds = array<i64: 64, 128>}]} {
    %c0 = arith.constant 0 : index
    %c0_0 = arith.constant 0 : index
    %0 = vector.load %arg1[%c0, %c0_0] : memref<64x32xf32, #tpu.memory_space<vmem>>, vector<64x32xf32>
    %c0_1 = arith.constant 0 : index
    %c0_2 = arith.constant 0 : index
    %1 = vector.load %arg2[%c0_1, %c0_2] : memref<32x128xf32, #tpu.memory_space<vmem>>, vector<32x128xf32>
    %cst = arith.constant dense<0.000000e+00> : vector<64x128xf32>
    %2 = tpu.matmul %0, %1, %cst {dimension_numbers = #tpu.dot_dimension_numbers<[1], [0], [0], [1], [0, 0, 1, 1], [], []>} : vector<64x32xf32>, vector<32x128xf32>, vector<64x128xf32> -> vector<64x128xf32>
    %c0_3 = arith.constant 0 : index
    %c0_4 = arith.constant 0 : index
    %3 = vector.load %arg3[%c0_3, %c0_4] : memref<1x128xf32, #tpu.memory_space<vmem>>, vector<1x128xf32>
    %4 = vector.broadcast %3 : vector<1x128xf32> to vector<64x128xf32>
    %5 = arith.addf %2, %4 : vector<64x128xf32>
    %cst_5 = arith.constant 0.000000e+00 : f32
    %6 = vector.broadcast %cst_5 : f32 to vector<64x128xf32>
    %7 = arith.maximumf %5, %6 : vector<64x128xf32>
    %c0_6 = arith.constant 0 : index
    %c0_7 = arith.constant 0 : index
    %8 = vector.load %arg4[%c0_6, %c0_7] : memref<128x128xf32, #tpu.memory_space<vmem>>, vector<128x128xf32>
    %cst_8 = arith.constant dense<0.000000e+00> : vector<64x128xf32>
    %9 = tpu.matmul %7, %8, %cst_8 {dimension_numbers = #tpu.dot_dimension_numbers<[1], [0], [0], [1], [0, 0, 1, 1], [], []>} : vector<64x128xf32>, vector<128x128xf32>, vector<64x128xf32> -> vector<64x128xf32>
    %c0_9 = arith.constant 0 : index
    %c0_10 = arith.constant 0 : index
    %10 = vector.load %arg5[%c0_9, %c0_10] : memref<1x128xf32, #tpu.memory_space<vmem>>, vector<1x128xf32>
    %11 = vector.broadcast %10 : vector<1x128xf32> to vector<64x128xf32>
    %12 = arith.addf %9, %11 : vector<64x128xf32>
    %c0_11 = arith.constant 0 : index
    %c0_12 = arith.constant 0 : index
    %13 = vector.load %arg6[%c0_11, %c0_12] : memref<64x128xf32, #tpu.memory_space<vmem>>, vector<64x128xf32>
    tpu.vector_store %arg6[%c0_11, %c0_12], %12 {strides = array<i32>} : memref<64x128xf32, #tpu.memory_space<vmem>>, vector<64x128xf32>,
    return
  }
  func.func @transform_0(%arg0: i32) -> (i32, i32) {
    %c0_i32 = arith.constant 0 : i32
    %c0_i32_0 = arith.constant 0 : i32
    return %arg0, %c0_i32 : i32, i32
  }
  func.func @transform_1(%arg0: i32) -> (i32, i32) {
    %c0_i32 = arith.constant 0 : i32
    %c0_i32_0 = arith.constant 0 : i32
    %c0_i32_1 = arith.constant 0 : i32
    return %c0_i32, %c0_i32_0 : i32, i32
  }
  func.func @transform_2(%arg0: i32) -> (i32, i32) {
    %c0_i32 = arith.constant 0 : i32
    %c0_i32_0 = arith.constant 0 : i32
    %c0_i32_1 = arith.constant 0 : i32
    return %c0_i32, %c0_i32_0 : i32, i32
  }
  func.func @transform_3(%arg0: i32) -> (i32, i32) {
    %c0_i32 = arith.constant 0 : i32
    %c0_i32_0 = arith.constant 0 : i32
    %c0_i32_1 = arith.constant 0 : i32
    return %c0_i32, %c0_i32_0 : i32, i32
  }
  func.func @transform_4(%arg0: i32) -> (i32, i32) {
    %c0_i32 = arith.constant 0 : i32
    %c0_i32_0 = arith.constant 0 : i32
    %c0_i32_1 = arith.constant 0 : i32
    return %c0_i32, %c0_i32_0 : i32, i32
  }
  func.func @transform_5(%arg0: i32) -> (i32, i32) {
    %c0_i32 = arith.constant 0 : i32
    %c0_i32_0 = arith.constant 0 : i32
    return %arg0, %c0_i32 : i32, i32
  }
}

</mosaic_0001>

<bundles_post_ra>
// kernel: deep_set_decoder_forward.1
= control target key start
LH: loop header
LB: loop body
LE: loop exit
PB: predicated region body
PF: predicated region fallthrough
CT: control target
= control target key end

     0   :  { %vm39_vm0 = vcmask 261120   ;;  %s635_s1 = inlined_call_operand.vmem [shape: f32[32,128], index: 1, kind: input, shape index: {}]   ;;  %s636_s0 = inlined_call_operand.vmem [shape: f32[64,32], index: 0, kind: input, shape index: {}]   ;;  %s637_s3 = inlined_call_operand.vmem [shape: f32[128,128], index: 3, kind: input, shape index: {}]   ;;  %s638_s2 = inlined_call_operand.vmem [shape: f32[1,128], index: 2, kind: input, shape index: {}]   ;;  %s639_s4 = inlined_call_operand.vmem [shape: f32[1,128], index: 4, kind: input, shape index: {}]   ;;  %s640_s5 = inlined_call_operand.vmem [shape: f32[64,128], index: 5, kind: output, shape index: {}]  }
   0x1   :  { %v28_v0 = vld [vmem:[%s635_s1] sm:$0xff]  ;;  %v29_v1 = vld [vmem:[%s635_s1 + $0x8] sm:$0xff]  ;;  %v30_v2 = vld [vmem:[%s635_s1 + $0x10] sm:$0xff] }
   0x2   :  { %v427_v3 = vpack.c.bf16 %v29_v1, %v28_v0  ;;  %v31_v4 = vld [vmem:[%s635_s1 + $0x18] sm:$0xff]  ;;  %v20_v5 = vld [vmem:[%s636_s0] sm:$0xff]  ;;  %v178_v8 = vld [vmem:[%s637_s3 + $0x8] sm:$0xff] }
   0x3   :  { %v431_v6 = vpack.c.bf16 %v31_v4, %v30_v2  ;;  %371 = vmatprep.mubr.msk.f32.mxu0 %vm39_vm0, %v20_v5  ;;  %v177_v7 = vld [vmem:[%s637_s3] sm:$0xff]  ;;  %v179_v9 = vld [vmem:[%s637_s3 + $0x10] sm:$0xff]  ;;  %v180_v11 = vld [vmem:[%s637_s3 + $0x18] sm:$0xff] }
   0x4   :  { %428 = vmatprep.subr.bf16.mxu0 %v427_v3  ;;  %v435_v10 = vpack.c.bf16 %v178_v8, %v177_v7  ;;  %v439_v12 = vpack.c.bf16 %v180_v11, %v179_v9  ;;  %v21_v13 = vld [vmem:[%s636_s0 + $0x8] sm:$0xff]  ;;  %v22_v14 = vld [vmem:[%s636_s0 + $0x10] sm:$0xff]  ;;  %v181_v15 = vld [vmem:[%s637_s3 + $0x20] sm:$0xff] }
   0x5   :  { %430 = vmatpush3.bf16.msra.mxu0 %v427_v3  ;;  %v182_v16 = vld [vmem:[%s637_s3 + $0x28] sm:$0xff]  ;;  %v23_v17 = vld [vmem:[%s636_s0 + $0x18] sm:$0xff]  ;;  %v24_v19 = vld [vmem:[%s636_s0 + $0x20] sm:$0xff] }
   0x6   :  { %432 = vmatprep.subr.bf16.mxu0 %v431_v6  ;;  %467 = vmatprep.subr.bf16.mxu1 %v435_v10  ;;  %v443_v18 = vpack.c.bf16 %v182_v16, %v181_v15  ;;  %v183_v20 = vld [vmem:[%s637_s3 + $0x30] sm:$0xff]  ;;  %v184_v21 = vld [vmem:[%s637_s3 + $0x38] sm:$0xff]  ;;  %v25_v22 = vld [vmem:[%s636_s0 + $0x28] sm:$0xff] }
   0x7   :  { %475 = vmatpush3.bf16.msra.mxu1 %v435_v10  ;;  %v447_v23 = vpack.c.bf16 %v184_v21, %v183_v20  ;;  %v26_v24 = vld [vmem:[%s636_s0 + $0x30] sm:$0xff]  ;;  %v185_v25 = vld [vmem:[%s637_s3 + $0x40] sm:$0xff]  ;;  %v186_v26 = vld [vmem:[%s637_s3 + $0x48] sm:$0xff] }
   0x8   :  { %468 = vmatprep.subr.bf16.mxu1 %v439_v12  ;;  %v27_v27 = vld [vmem:[%s636_s0 + $0x38] sm:$0xff]  ;;  %v451_v28 = vpack.c.bf16 %v186_v26, %v185_v25  ;;  %v187_v29 = vld [vmem:[%s637_s3 + $0x50] sm:$0xff]  ;;  %v189_v32 = vld [vmem:[%s637_s3 + $0x60] sm:$0xff] }
   0x9   :  { %434 = vmatpush3.bf16.msra.mxu0 %v431_v6  ;;  %v188_v30 = vld [vmem:[%s637_s3 + $0x58] sm:$0xff]  ;;  %v190_v33 = vld [vmem:[%s637_s3 + $0x68] sm:$0xff]  ;;  %v191_v35 = vld [vmem:[%s637_s3 + $0x70] sm:$0xff] }
   0xa   :  { %436 = vmatprep.subr.bf16.mxu0 %v435_v10  ;;  %v455_v31 = vpack.c.bf16 %v188_v30, %v187_v29  ;;  %v459_v34 = vpack.c.bf16 %v190_v33, %v189_v32  ;;  %v192_v36 = vld [vmem:[%s637_s3 + $0x78] sm:$0xff]  ;;  %v317_v38 = vld [vmem:[%s638_s2] ss:$0 sm:$0xff] }
   0xb   :  { %476 = vmatpush3.bf16.msra.mxu1 %v439_v12  ;;  %v463_v37 = vpack.c.bf16 %v192_v36, %v191_v35  ;;  %v326_v63 = vld [vmem:[%s639_s4] ss:$0 sm:$0xff] }
   0xc   :  { %372 = vmatmul.mubr.msk.f32.vlgmr.msra.gmra.mrb[0].mxu0 %vm39_vm0, %v21_v13  ;;  %469 = vmatprep.subr.bf16.mxu1 %v443_v18 }
   0xd   :  { %374 = vmatprep.mubr.msk.f32.mxu0 %vm39_vm0, %v22_v14  ;;  %438 = vmatpush3.bf16.msra.mxu0 %v435_v10 }
   0xe   :  { %440 = vmatprep.subr.bf16.mxu0 %v439_v12 }
   0xf   :  { %477 = vmatpush3.bf16.msra.mxu1 %v443_v18 }
  0x10   :  { %375 = vmatmul.mubr.msk.f32.gmra.mrb[2].mxu0 %vm39_vm0, %v23_v17  ;;  %470 = vmatprep.subr.bf16.mxu1 %v447_v23 }
  0x11   :  { %377 = vmatprep.mubr.msk.f32.mxu0 %vm39_vm0, %v24_v19  ;;  %442 = vmatpush3.bf16.msra.mxu0 %v439_v12 }
  0x12   :  { %444 = vmatprep.subr.bf16.mxu0 %v443_v18 }
  0x13   :  { %478 = vmatpush3.bf16.msra.mxu1 %v447_v23 }
  0x14   :  { %378 = vmatmul.mubr.msk.f32.gmra.mrb[4].mxu0 %vm39_vm0, %v25_v22  ;;  %471 = vmatprep.subr.bf16.mxu1 %v451_v28 }
  0x15   :  { %380 = vmatprep.mubr.msk.f32.mxu0 %vm39_vm0, %v26_v24  ;;  %446 = vmatpush3.bf16.msra.mxu0 %v443_v18 }
  0x16   :  { %448 = vmatprep.subr.bf16.mxu0 %v447_v23 }
  0x17   :  { %479 = vmatpush3.bf16.msra.mxu1 %v451_v28 }
  0x18   :  { %381 = vmatmul.mubr.msk.f32.gmra.mrb[6].mxu0 %vm39_vm0, %v27_v27  ;;  %472 = vmatprep.subr.bf16.mxu1 %v455_v31 }
  0x19   :  { %450 = vmatpush3.bf16.msra.mxu0 %v447_v23 }
  0x1a   :  { %452 = vmatprep.subr.bf16.mxu0 %v451_v28 }
  0x1b   :  { %480 = vmatpush3.bf16.msra.mxu1 %v455_v31 }
  0x1c   :  { %473 = vmatprep.subr.bf16.mxu1 %v459_v34 }
  0x1d   :  { %454 = vmatpush3.bf16.msra.mxu0 %v451_v28 }
  0x1e   :  { %456 = vmatprep.subr.bf16.mxu0 %v455_v31 }
  0x1f   :  { %481 = vmatpush3.bf16.msra.mxu1 %v459_v34 }
  0x20   :  { %474 = vmatprep.subr.bf16.mxu1 %v463_v37 }
  0x21   :  { %458 = vmatpush3.bf16.msra.mxu0 %v455_v31 }
  0x22   :  { %460 = vmatprep.subr.bf16.mxu0 %v459_v34 }
  0x23   :  { %482 = vmatpush3.bf16.msra.mxu1 %v463_v37 }
  0x25   :  { %462 = vmatpush3.bf16.msra.mxu0 %v459_v34 }
  0x26   :  { %464 = vmatprep.subr.bf16.mxu0 %v463_v37 }
  0x29   :  { %466 = vmatpush3.bf16.msra.mxu0 %v463_v37 }
  0xdf   :  { %v373_v39 = vpop.f32.mrb[0].mxu0 }
  0xe0   :  { %v136_v40 = vadd.f32 %v373_v39, %v317_v38  ;;  %v130_v41 = vpop.f32.mrb[1].mxu0 }
  0xe1   :  { %v131_v42 = vadd.f32 %v317_v38, %v130_v41 }
  0xe2   :  { %v170_v45 = vmax.f32 %v136_v40, 0.0 }
  0xe3   :  { %v169_v43 = vmax.f32 %v131_v42, 0.0  ;;  %v376_v44 = vpop.f32.mrb[2].mxu0 }
  0xe4   :  { %v146_v46 = vadd.f32 %v376_v44, %v317_v38  ;;  %v140_v47 = vpop.f32.mrb[3].mxu0 }
  0xe5   :  { %415 = vmatprep.mubr.f32.mxu0 %v169_v43  ;;  %v141_v48 = vadd.f32 %v317_v38, %v140_v47 }
  0xe6   :  { %416 = vmatmul.mubr.f32.vlgmr.msra.gmra.mrb[8].mxu0 %v170_v45  ;;  %v172_v51 = vmax.f32 %v146_v46, 0.0 }
  0xe7   :  { %v379_v49 = vpop.f32.mrb[4].mxu0  ;;  %v171_v50 = vmax.f32 %v141_v48, 0.0 }
  0xe8   :  { %v156_v52 = vadd.f32 %v379_v49, %v317_v38  ;;  %v150_v53 = vpop.f32.mrb[5].mxu0 }
  0xe9   :  { %v151_v54 = vadd.f32 %v317_v38, %v150_v53  ;;  %418 = vmatprep.mubr.f32.mxu1 %v171_v50 }
  0xea   :  { %419 = vmatmul.mubr.f32.vlgmr.msra.gmra.mrb[0].mxu1 %v172_v51  ;;  %v174_v57 = vmax.f32 %v156_v52, 0.0 }
  0xeb   :  { %v173_v55 = vmax.f32 %v151_v54, 0.0  ;;  %v382_v56 = vpop.f32.mrb[6].mxu0 }
  0xec   :  { %v166_v58 = vadd.f32 %v382_v56, %v317_v38  ;;  %v160_v59 = vpop.f32.mrb[7].mxu0 }
  0xed   :  { %v161_v60 = vadd.f32 %v317_v38, %v160_v59  ;;  %421 = vmatprep.mubr.f32.mxu1 %v173_v55 }
  0xee   :  { %422 = vmatmul.mubr.f32.gmra.mrb[2].mxu1 %v174_v57  ;;  %v176_v62 = vmax.f32 %v166_v58, 0.0 }
  0xef   :  { %v175_v61 = vmax.f32 %v161_v60, 0.0 }
  0xf1   :  { %424 = vmatprep.mubr.f32.mxu1 %v175_v61 }
  0xf2   :  { %425 = vmatmul.mubr.f32.gmra.mrb[4].mxu1 %v176_v62 }
 0x1b9   :  { %v417_v0 = vpop.f32.mrb[8].mxu0 }
 0x1ba   :  { %v272_v1 = vadd.f32 %v417_v0, %v326_v63  ;;  %v266_v2 = vpop.f32.mrb[9].mxu0 }
 0x1bb   :  { %v267_v3 = vadd.f32 %v326_v63, %v266_v2 }
 0x1bc   :  { %306 = vst [vmem:[%s640_s5 + $0x8] sm:$0xff] %v272_v1 }
 0x1bd   :  { %305 = vst [vmem:[%s640_s5] sm:$0xff] %v267_v3  ;;  %v420_v4 = vpop.f32.mrb[0].mxu1 }
 0x1be   :  { %v282_v5 = vadd.f32 %v420_v4, %v326_v63  ;;  %v276_v6 = vpop.f32.mrb[1].mxu1 }
 0x1bf   :  { %v277_v7 = vadd.f32 %v326_v63, %v276_v6 }
 0x1c0   :  { %308 = vst [vmem:[%s640_s5 + $0x18] sm:$0xff] %v282_v5 }
 0x1c1   :  { %307 = vst [vmem:[%s640_s5 + $0x10] sm:$0xff] %v277_v7  ;;  %v423_v8 = vpop.f32.mrb[2].mxu1 }
 0x1c2   :  { %v292_v9 = vadd.f32 %v423_v8, %v326_v63  ;;  %v286_v10 = vpop.f32.mrb[3].mxu1 }
 0x1c3   :  { %v287_v11 = vadd.f32 %v326_v63, %v286_v10 }
 0x1c4   :  { %310 = vst [vmem:[%s640_s5 + $0x28] sm:$0xff] %v292_v9 }
 0x1c5   :  { %309 = vst [vmem:[%s640_s5 + $0x20] sm:$0xff] %v287_v11  ;;  %v426_v12 = vpop.f32.mrb[4].mxu1 }
 0x1c6   :  { %v302_v13 = vadd.f32 %v426_v12, %v326_v63  ;;  %v296_v14 = vpop.f32.mrb[5].mxu1 }
 0x1c7   :  { %v297_v15 = vadd.f32 %v326_v63, %v296_v14 }
 0x1c8   :  { %312 = vst [vmem:[%s640_s5 + $0x38] sm:$0xff] %v302_v13 }
 0x1c9   :  { %311 = vst [vmem:[%s640_s5 + $0x30] sm:$0xff] %v297_v15 }

</bundles_post_ra>
